<compile_context>
chip_gen: v6e
topology: v6e:2x2x1
jax: 0.10.0
libtpu: 0.0.40
codegen_flags: <defaults>
</compile_context>

<pallas_src>
import functools

import jax
import jax.numpy as jnp
from jax.experimental import pallas as pl
from jax.experimental.pallas import tpu as pltpu


_MAX_ROW_TILE = 1024                 # 1024 x 512 f32 = 2 MiB per block
_COL_CANDIDATES = (512, 384, 256, 128)   # lane-dense (multiples of 128)
_SUBLANE_BY_ITEMSIZE = {4: 8, 2: 16, 1: 32}   # dtype-aware sublane alignment


def _round_up(x: int, m: int) -> int:
    return (x + m - 1) // m * m


def _copy_kernel(x_ref, o_ref):
    # Full-tile, full-lane-width pass-through: one unmasked vst stream.
    o_ref[...] = x_ref[...]


def _pick_row_tile(rows: int, sub: int) -> tuple[int, int]:
    """Return (row_tile, rows_padded).  Prefers pad == 0 (row_tile divides
    rows), sublane-aligned tiles, and >= 2 grid steps for v7x dual-TC."""
    if rows <= sub:
        # Tiny input: one full-array block (full dims exempt from (8,128) rule).
        return rows, rows
    # Cap so that, when there is enough data, the grid has >= 2 steps and the
    # "parallel" axis can actually shard across two TensorCores on v7x.
    cap = min(_MAX_ROW_TILE, rows // 2 if rows >= 2 * sub else rows)
    cap = max(cap, sub)
    # Largest sublane-aligned divisor of rows not exceeding cap -> pad == 0.
    t = (cap // sub) * sub
    while t >= sub:
        if rows % t == 0:
            return t, rows
        t -= sub
    # Rare fallback: no clean divisor -> pad rows up to a whole tile.
    t = (cap // sub) * sub
    return t, _round_up(rows, t)


def _choose_cols(n: int) -> int:
    """Widest lane-dense column count that divides n exactly (pad == 0),
    falling back to 512 (padding) otherwise."""
    for c in _COL_CANDIDATES:
        if n % c == 0:
            return c
    return _COL_CANDIDATES[0]


@jax.jit
def vit_identity_bandwidth_kernel(images: jax.Array) -> jax.Array:
    """Streams `images` unchanged through a lane-dense, tile-pipelined Pallas
    TPU kernel.  Exists purely as an HBM-bandwidth benchmark of the module's
    only defined data path; the semantically fastest identity is
    `vit_identity` below (no kernel)."""
    orig_shape, dtype = images.shape, images.dtype
    n = images.size
    itemsize = jnp.dtype(dtype).itemsize
    sub = _SUBLANE_BY_ITEMSIZE.get(itemsize, 8)

    cols = _choose_cols(n)                     # lane-dense, usually pad == 0
    rows = pl.cdiv(n, cols)
    row_tile, rows_padded = _pick_row_tile(rows, sub)
    pad = rows_padded * cols - n

    flat = images.reshape(-1)
    if pad:
        # Rare fallback; fuses under jit.
        # TODO(synk): could instead mask the ragged tail in-kernel via scalar
        # prefetch + pltpu.store(mask=...) to avoid the pad entirely.
        flat = jnp.pad(flat, (0, pad))
    x2d = flat.reshape(rows_padded, cols)

    grid = (rows_padded // row_tile,)
    bytes_accessed = 2 * rows_padded * cols * itemsize

    # TODO(synk): if a physically distinct output at very large sizes is ever
    # the goal, a chunked HBM->HBM pltpu.make_async_copy ring (memory_space=
    # pl.ANY) avoids the vld/vst vreg path; kept in-core here for clarity.
    y2d = pl.pallas_call(
        _copy_kernel,
        out_shape=jax.ShapeDtypeStruct((rows_padded, cols), dtype),
        grid_spec=pltpu.PrefetchScalarGridSpec(
            num_scalar_prefetch=0,
            grid=grid,
            in_specs=[pl.BlockSpec((row_tile, cols), lambda i: (i, 0))],
            out_specs=pl.BlockSpec((row_tile, cols), lambda i: (i, 0)),
        ),
        compiler_params=pltpu.CompilerParams(
            # Row-tile axis is independent: lets v7x shard across both TCs;
            # measured ~neutral (harmless) on single-TC v5e/v6e.
            dimension_semantics=("parallel",),
            # Explicit scoped-VMEM budget: blocks are <= 2 MiB, so in+out
            # double-buffered is <= 8 MiB -- safe on v5e (16 MiB default),
            # v6e, and v7x's 64 MiB/TC physical VMEM.
            vmem_limit_bytes=32 << 20,
        ),
        cost_estimate=pl.CostEstimate(
            flops=0, transcendentals=0, bytes_accessed=bytes_accessed),
    )(x2d)

    out = y2d.reshape(-1)
    if pad:
        out = out[:n]
    return out.reshape(orig_shape)


def vit_identity(images: jax.Array) -> jax.Array:
    """Fastest correct identity for the module's input path: no kernel, no
    HBM traffic (per performance review)."""
    return images


def my_vit_forward(images: jax.Array):
    """Exact semantic equivalent of MyViT.forward(images): the reference body
    is `pass`, so it returns None regardless of the input."""
    # TODO(synk): reference MyViT.forward is an empty stub (`pass`); no ViT
    # compute (patch-embed matmul, MHSA, MLP) exists to translate.  When it
    # lands upstream, those become MXU-tiled bf16 kernels with f32
    # accumulators, reduction axis last ("arbitrary"), "parallel" on M/N,
    # 256-multiple tiles on v6e/v7x (2x256x256 MXU, fp8-not-int8 on v7x) and
    # 128-multiples on v5e -- not this identity path.
    del images
    return None


if __name__ == "__main__":
    key = jax.random.PRNGKey(0)
    # Small NCHW image batch consistent with a ViT-style input.
    images = jax.random.normal(key, (2, 4, 16, 16), dtype=jnp.float32)

    # Fast path: identity is a pure pass-through (no kernel launched).
    assert vit_identity(images) is images

    # Exercise the tuned Pallas bandwidth kernel once and verify exact copy.
    y = vit_identity_bandwidth_kernel(images)
    jax.block_until_ready(y)
    assert y.shape == images.shape and y.dtype == images.dtype
    assert bool(jnp.all(y == images))

    # Semantic-equivalent forward (returns None, like the PyTorch stub).
    out = my_vit_forward(images)
    assert out is None

    print("KERNEL_OK")
</pallas_src>

<mosaic_0001>
module attributes {stable_mosaic.version = 11 : i64} {
  func.func @_copy_kernel(%arg0: i32, %arg1: memref<4x512xf32, #tpu.memory_space<vmem>>, %arg2: memref<4x512xf32, #tpu.memory_space<vmem>>) attributes {dimension_semantics = [#tpu.dimension_semantics<parallel>], iteration_bounds = array<i64: 1>, scalar_prefetch = 0 : i64, scratch_operands = 0 : i64, tpu.core_type = #tpu.core_type<tc>, window_params = [{transform_indices = @transform_0, window_bounds = array<i64: 4, 512>}, {transform_indices = @transform_1, window_bounds = array<i64: 4, 512>}]} {
    %c0 = arith.constant 0 : index
    %c0_0 = arith.constant 0 : index
    %0 = vector.load %arg1[%c0, %c0_0] : memref<4x512xf32, #tpu.memory_space<vmem>>, vector<4x512xf32>
    %c0_1 = arith.constant 0 : index
    %c0_2 = arith.constant 0 : index
    %1 = vector.load %arg2[%c0_1, %c0_2] : memref<4x512xf32, #tpu.memory_space<vmem>>, vector<4x512xf32>
    tpu.vector_store %arg2[%c0_1, %c0_2], %0 {strides = array<i32>} : memref<4x512xf32, #tpu.memory_space<vmem>>, vector<4x512xf32>,
    return
  }
  func.func @transform_0(%arg0: i32) -> (i32, i32) {
    %c0_i32 = arith.constant 0 : i32
    %c0_i32_0 = arith.constant 0 : i32
    return %arg0, %c0_i32 : i32, i32
  }
  func.func @transform_1(%arg0: i32) -> (i32, i32) {
    %c0_i32 = arith.constant 0 : i32
    %c0_i32_0 = arith.constant 0 : i32
    return %arg0, %c0_i32 : i32, i32
  }
}

</mosaic_0001>

<bundles_post_ra>
// kernel: vit_identity_bandwidth_kernel.1
= control target key start
LH: loop header
LB: loop body
LE: loop exit
PB: predicated region body
PF: predicated region fallthrough
CT: control target
= control target key end

     0   :  { %s38_s0 = inlined_call_operand.vmem [shape: f32[4,512], index: 0, kind: input, shape index: {}]   ;;  %s39_s1 = inlined_call_operand.vmem [shape: f32[4,512], index: 1, kind: output, shape index: {}]  }
   0x1   :  { %v8_v0 = vld [vmem:[%s38_s0] sm:$0xff]  ;;  %v9_v1 = vld [vmem:[%s38_s0 + $0x8] sm:$0xff] }
   0x2   :  { %10 = vst [vmem:[%s39_s1] sm:$0xff] %v8_v0  ;;  %11 = vst [vmem:[%s39_s1 + $0x8] sm:$0xff] %v9_v1 }

</bundles_post_ra>
